<compile_context>
chip_gen: v7x
topology: tpu7x:2x2x1
jax: 0.10.0
libtpu: 0.0.40
codegen_flags: <defaults>
</compile_context>

<pallas_src>
import functools

import jax
import jax.numpy as jnp
from jax import lax
from jax.experimental import pallas as pl
from jax.experimental.pallas import tpu as pltpu


# ---------------------------------------------------------------------------
# Kernels
# ---------------------------------------------------------------------------
def _decoder_kernel_eval(z_ref, w_ref, b_ref, o_ref):
    # out = z @ W + b   (W pre-transposed to [D, O]; dropout identity in eval)
    acc = jnp.dot(z_ref[...], w_ref[...], preferred_element_type=jnp.float32)
    o_ref[...] = (acc + b_ref[...]).astype(o_ref.dtype)


def _hash_u32(x):
    # murmur/splitmix-style 32-bit finalizer (pure VPU int ops).
    x = x ^ (x >> 16)
    x = x * jnp.uint32(0x7FEB352D)
    x = x ^ (x >> 15)
    x = x * jnp.uint32(0x846CA68B)
    x = x ^ (x >> 16)
    return x


def _decoder_kernel_train(seed_ref, z_ref, w_ref, b_ref, o_ref, *, p, tile_n):
    # Inverted dropout (keep-prob 1-p) via counter-based hash, then linear.
    shape = z_ref.shape
    rows = lax.broadcasted_iota(jnp.uint32, shape, 0)
    cols = lax.broadcasted_iota(jnp.uint32, shape, 1)
    row_off = (pl.program_id(0) * tile_n).astype(jnp.uint32)
    idx = (rows + row_off) * jnp.uint32(shape[1]) + cols        # global element id
    bits = _hash_u32(idx * jnp.uint32(0x9E3779B9)
                     + seed_ref[0].astype(jnp.uint32))
    threshold = jnp.uint32(min(int(p * 4294967296.0), 4294967295))  # p * 2^32
    keep = bits >= threshold
    scale = jnp.float32(1.0 / (1.0 - p))
    z = jnp.where(keep, z_ref[...].astype(jnp.float32) * scale, jnp.float32(0.0))
    acc = jnp.dot(z, w_ref[...], preferred_element_type=jnp.float32)
    o_ref[...] = (acc + b_ref[...]).astype(o_ref.dtype)


# ---------------------------------------------------------------------------
# Tiling helpers
# ---------------------------------------------------------------------------
def _round_up(x, m):
    return ((x + m - 1) // m) * m


def _pick_tile_n(n, d, o, bytes_per_elem=4, budget=24 * 1024 * 1024):
    """Largest batch tile (<=4096, multiple of 8) fitting a conservative VMEM
    budget valid on all generations (v7x: 64 MiB phys / 32 MiB scoped)."""
    fixed = 2 * (d * o + o) * bytes_per_elem          # resident weight + bias
    tile = min(4096, _round_up(n, 8))
    while tile > 8:
        need = fixed + 2 * tile * (d + o) * bytes_per_elem  # dbl-buffered z + out
        if need <= budget:
            break
        tile //= 2
    tile = max(8, _round_up(tile, 8))
    # v7x megacore: keep >= 2 grid steps on large batches so both TCs get work.
    if n >= 1024:
        tile = min(tile, max(8, _round_up(-(-n // 2), 8)))
    return tile


# ---------------------------------------------------------------------------
# Wrapper
# ---------------------------------------------------------------------------
@functools.partial(jax.jit, static_argnames=("dropout", "training"))
def regression_decoder(z, weight, bias, seed=0, *, dropout=0.0, training=False):
    """z: [N, D]; weight: [O, D] (nn.Linear layout); bias: [O]  ->  [N, O]"""
    n, d = z.shape
    o = weight.shape[0]

    use_dropout = bool(training) and float(dropout) > 0.0
    if use_dropout and float(dropout) >= 1.0:
        # PyTorch F.dropout(p=1.0) zeroes the input; degenerate case.
        z = jnp.zeros_like(z)
        use_dropout = False

    w_t = weight.T                      # [D, O] — tiny one-time op, fused under jit
    b2 = bias.reshape(1, o)

    tile_n = _pick_tile_n(n, d, o)
    grid = (pl.cdiv(n, tile_n),)        # ragged last block handled by Pallas

    out_shape = jax.ShapeDtypeStruct((n, o), z.dtype)
    cost = pl.CostEstimate(flops=2 * n * d * o, transcendentals=0,
                           bytes_accessed=(n * d + n * o + d * o + o) * 4)
    compiler_params = pltpu.CompilerParams(
        dimension_semantics=("parallel",),      # megacore split on v7x
        vmem_limit_bytes=32 * 1024 * 1024,
    )

    if use_dropout:
        seed_arr = jnp.asarray(seed, dtype=jnp.int32).reshape(1)
        grid_spec = pltpu.PrefetchScalarGridSpec(
            num_scalar_prefetch=1,
            grid=grid,
            in_specs=[
                pl.BlockSpec((tile_n, d), lambda i, s: (i, 0)),
                pl.BlockSpec((d, o), lambda i, s: (0, 0)),   # weight: resident
                pl.BlockSpec((1, o), lambda i, s: (0, 0)),   # bias: resident
            ],
            out_specs=pl.BlockSpec((tile_n, o), lambda i, s: (i, 0)),
        )
        kernel = functools.partial(_decoder_kernel_train,
                                   p=float(dropout), tile_n=tile_n)
        out = pl.pallas_call(kernel, out_shape=out_shape, grid_spec=grid_spec,
                             compiler_params=compiler_params,
                             cost_estimate=cost)(seed_arr, z, w_t, b2)
    else:
        grid_spec = pl.GridSpec(
            grid=grid,
            in_specs=[
                pl.BlockSpec((tile_n, d), lambda i: (i, 0)),
                pl.BlockSpec((d, o), lambda i: (0, 0)),
                pl.BlockSpec((1, o), lambda i: (0, 0)),
            ],
            out_specs=pl.BlockSpec((tile_n, o), lambda i: (i, 0)),
        )
        out = pl.pallas_call(_decoder_kernel_eval, out_shape=out_shape,
                             grid_spec=grid_spec,
                             compiler_params=compiler_params,
                             cost_estimate=cost)(z, w_t, b2)
    return out


# ---------------------------------------------------------------------------
# Deterministic parameter init (mirrors nn.Linear: U(-1/sqrt(D), 1/sqrt(D)))
# ---------------------------------------------------------------------------
def init_params(key, input_dim, output_dim):
    kw, kb = jax.random.split(key)
    bound = 1.0 / (input_dim ** 0.5)
    weight = jax.random.uniform(kw, (output_dim, input_dim),
                                minval=-bound, maxval=bound, dtype=jnp.float32)
    bias = jax.random.uniform(kb, (output_dim,),
                              minval=-bound, maxval=bound, dtype=jnp.float32)
    return weight, bias


if __name__ == "__main__":
    key = jax.random.PRNGKey(0)
    k_z, k_p = jax.random.split(key)

    # Small shapes; N=50 exercises the ragged (partial) last batch block.
    N, INPUT_DIM, OUTPUT_DIM = 50, 32, 16
    DROPOUT = 0.5

    z = jax.random.normal(k_z, (N, INPUT_DIM), dtype=jnp.float32)
    weight, bias = init_params(k_p, INPUT_DIM, OUTPUT_DIM)

    # Inference (training=False): dropout is identity, matches PyTorch eval mode.
    out = regression_decoder(z, weight, bias, dropout=DROPOUT, training=False)
    out = jax.block_until_ready(out)

    ref = z @ weight.T + bias
    assert out.shape == (N, OUTPUT_DIM)
    assert jnp.allclose(out, ref, atol=1e-5, rtol=1e-5)

    # Training path: deterministic in-kernel hash-based dropout.
    out_tr = regression_decoder(z, weight, bias, seed=123,
                                dropout=DROPOUT, training=True)
    out_tr = jax.block_until_ready(out_tr)
    assert out_tr.shape == (N, OUTPUT_DIM)
    assert bool(jnp.all(jnp.isfinite(out_tr)))

    print("KERNEL_OK")
</pallas_src>

<mosaic_0001>
module attributes {stable_mosaic.version = 11 : i64} {
  func.func @_decoder_kernel_eval(%arg0: i32, %arg1: memref<56x32xf32, #tpu.memory_space<vmem>>, %arg2: memref<32x16xf32, #tpu.memory_space<vmem>>, %arg3: memref<1x16xf32, #tpu.memory_space<vmem>>, %arg4: memref<56x16xf32, #tpu.memory_space<vmem>>) attributes {dimension_semantics = [#tpu.dimension_semantics<parallel>], iteration_bounds = array<i64: 1>, scalar_prefetch = 0 : i64, scratch_operands = 0 : i64, tpu.core_type = #tpu.core_type<tc>, window_params = [{transform_indices = @transform_0, window_bounds = array<i64: 56, 32>}, {pipeline_mode = #tpu.pipeline_mode<synchronous>, transform_indices = @transform_1, window_bounds = array<i64: 32, 16>}, {pipeline_mode = #tpu.pipeline_mode<synchronous>, transform_indices = @transform_2, window_bounds = array<i64: 1, 16>}, {transform_indices = @transform_3, window_bounds = array<i64: 56, 16>}]} {
    %c0 = arith.constant 0 : index
    %c0_0 = arith.constant 0 : index
    %0 = vector.load %arg1[%c0, %c0_0] : memref<56x32xf32, #tpu.memory_space<vmem>>, vector<56x32xf32>
    %c0_1 = arith.constant 0 : index
    %c0_2 = arith.constant 0 : index
    %1 = vector.load %arg2[%c0_1, %c0_2] : memref<32x16xf32, #tpu.memory_space<vmem>>, vector<32x16xf32>
    %cst = arith.constant dense<0.000000e+00> : vector<56x16xf32>
    %2 = tpu.matmul %0, %1, %cst {dimension_numbers = #tpu.dot_dimension_numbers<[1], [0], [0], [1], [0, 0, 1, 1], [], []>} : vector<56x32xf32>, vector<32x16xf32>, vector<56x16xf32> -> vector<56x16xf32>
    %c0_3 = arith.constant 0 : index
    %c0_4 = arith.constant 0 : index
    %3 = vector.load %arg3[%c0_3, %c0_4] : memref<1x16xf32, #tpu.memory_space<vmem>>, vector<1x16xf32>
    %4 = vector.broadcast %3 : vector<1x16xf32> to vector<56x16xf32>
    %5 = arith.addf %2, %4 : vector<56x16xf32>
    %c0_5 = arith.constant 0 : index
    %c0_6 = arith.constant 0 : index
    %6 = vector.load %arg4[%c0_5, %c0_6] : memref<56x16xf32, #tpu.memory_space<vmem>>, vector<56x16xf32>
    tpu.vector_store %arg4[%c0_5, %c0_6], %5 {strides = array<i32>} : memref<56x16xf32, #tpu.memory_space<vmem>>, vector<56x16xf32>,
    return
  }
  func.func @transform_0(%arg0: i32) -> (i32, i32) {
    %c0_i32 = arith.constant 0 : i32
    %c0_i32_0 = arith.constant 0 : i32
    return %arg0, %c0_i32 : i32, i32
  }
  func.func @transform_1(%arg0: i32) -> (i32, i32) {
    %c0_i32 = arith.constant 0 : i32
    %c0_i32_0 = arith.constant 0 : i32
    %c0_i32_1 = arith.constant 0 : i32
    return %c0_i32, %c0_i32_0 : i32, i32
  }
  func.func @transform_2(%arg0: i32) -> (i32, i32) {
    %c0_i32 = arith.constant 0 : i32
    %c0_i32_0 = arith.constant 0 : i32
    %c0_i32_1 = arith.constant 0 : i32
    return %c0_i32, %c0_i32_0 : i32, i32
  }
  func.func @transform_3(%arg0: i32) -> (i32, i32) {
    %c0_i32 = arith.constant 0 : i32
    %c0_i32_0 = arith.constant 0 : i32
    return %arg0, %c0_i32 : i32, i32
  }
}

</mosaic_0001>

<bundles_post_ra>
// kernel: regression_decoder.1
= control target key start
LH: loop header
LB: loop body
LE: loop exit
PB: predicated region body
PF: predicated region fallthrough
CT: control target
= control target key end

     0   :  { %v227_v0 = vmov 0.0|0.0   ;;  %vm228_vm0 = vmmov 0   ;;  %v229_v6 = vmov 0.0   ;;  %vm32_vm1 = vcmask 261120   ;;  %s328_s1 = inlined_call_operand.vmem [shape: f32[32,16], index: 1, kind: input, shape index: {}]   ;;  %s329_s0 = inlined_call_operand.vmem [shape: f32[50,32], index: 0, kind: input, shape index: {}]   ;;  %s330_s2 = inlined_call_operand.vmem [shape: f32[1,16], index: 2, kind: input, shape index: {}]   ;;  %s331_s3 = inlined_call_operand.vmem [shape: f32[50,16], index: 3, kind: output, shape index: {}]  }
   0x1   :  { %214 = vmatprep.subr.bf16.mxu0 %v227_v0  ;;  %v21_v1 = vld [vmem:[%s328_s1] sm:$0xff]  ;;  %v22_v2 = vld [vmem:[%s328_s1 + $0x8] sm:$0xff]  ;;  %220 = vmatprep.subr.bf16.mxu1 %v227_v0  ;;  %v23_v3 = vld [vmem:[%s328_s1 + $0x10] sm:$0xff]  ;;  %vm154_vm2 = vcmask 130048  }
   0x2   :  { %v215_v4 = vpack.c.bf16 %v22_v2, %v21_v1  ;;  %v24_v5 = vld [vmem:[%s328_s1 + $0x18] sm:$0xff]  ;;  %193 = vmatprep.mubr.msk.f32.mxu0 %vm228_vm0, %v229_v6  ;;  %205 = vmatprep.mubr.msk.f32.mxu1 %vm228_vm0, %v229_v6  ;;  %v14_v8 = vld [vmem:[%s329_s0] sm:$0xff]  ;;  %v15_v10 = vld [vmem:[%s329_s0 + $0x8] sm:$0xff] }
   0x3   :  { %v218_v7 = vpack.c.bf16 %v24_v5, %v23_v3  ;;  %v18_v9 = vld [vmem:[%s329_s0 + $0x20] sm:$0xff]  ;;  %v19_v11 = vld [vmem:[%s329_s0 + $0x28] sm:$0xff]  ;;  %v16_v12 = vld [vmem:[%s329_s0 + $0x10] sm:$0xff] }
   0x4   :  { %216 = vmatpush3.bf16.msra.mxu0 %v215_v4  ;;  %222 = vmatpush3.bf16.msra.mxu1 %v215_v4  ;;  %v20_v13 = vld [vmem:[%s329_s0 + $0x30] sm:$0xff]  ;;  %v17_v14 = vld [vmem:[%s329_s0 + $0x18] sm:$0xff]  ;;  %v166_v15 = vld [vmem:[%s330_s2] ss:$0 sm:$0xff] }
   0x5   :  { %217 = vmatprep.subr.bf16.mxu0 %v227_v0  ;;  %221 = vmatprep.subr.bf16.mxu1 %v227_v0 }
   0x8   :  { %219 = vmatpush3.bf16.msra.mxu0 %v218_v7  ;;  %223 = vmatpush3.bf16.msra.mxu1 %v218_v7 }
   0xb   :  { %194 = vmatmul.mubr.msk.f32.vlgmr.msra.gmra.mrb[0].mxu0 %vm32_vm1, %v14_v8  ;;  %206 = vmatmul.mubr.msk.f32.vlgmr.msra.gmra.mrb[0].mxu1 %vm32_vm1, %v18_v9 }
   0xc   :  { %196 = vmatprep.mubr.msk.f32.mxu0 %vm228_vm0, %v229_v6  ;;  %208 = vmatprep.mubr.msk.f32.mxu1 %vm228_vm0, %v229_v6 }
   0xf   :  { %197 = vmatmul.mubr.msk.f32.gmra.mrb[2].mxu0 %vm32_vm1, %v15_v10  ;;  %209 = vmatmul.mubr.msk.f32.gmra.mrb[2].mxu1 %vm32_vm1, %v19_v11 }
  0x10   :  { %199 = vmatprep.mubr.msk.f32.mxu0 %vm228_vm0, %v229_v6  ;;  %211 = vmatprep.mubr.msk.f32.mxu1 %vm228_vm0, %v229_v6 }
  0x13   :  { %200 = vmatmul.mubr.msk.f32.gmra.mrb[4].mxu0 %vm32_vm1, %v16_v12  ;;  %212 = vmatmul.mubr.msk.f32.gmra.mrb[4].mxu1 %vm32_vm1, %v20_v13 }
  0x14   :  { %202 = vmatprep.mubr.msk.f32.mxu0 %vm228_vm0, %v229_v6 }
  0x17   :  { %203 = vmatmul.mubr.msk.f32.gmra.mrb[6].mxu0 %vm32_vm1, %v17_v14 }
  0xde   :  { %v120_v16 = vpop.f32.mrb[0].mxu0  ;;  %v140_v17 = vpop.f32.mrb[0].mxu1 }
  0xdf   :  { %v121_v18 = vadd.f32 %v166_v15, %v120_v16  ;;  %v195_v19 = vpop.f32.mrb[1].mxu0  ;;  %v141_v20 = vadd.f32 %v166_v15, %v140_v17  ;;  %v207_v21 = vpop.f32.mrb[1].mxu1 }
  0xe1   :  { %155 = vst.msk [vmem:[%s331_s3] sm:$0xff] %vm154_vm2, %v121_v18  ;;  %159 = vst.msk [vmem:[%s331_s3 + $0x20] sm:$0xff] %vm154_vm2, %v141_v20 }
  0xe2   :  { %v125_v22 = vpop.f32.mrb[2].mxu0  ;;  %v145_v23 = vpop.f32.mrb[2].mxu1 }
  0xe3   :  { %v126_v24 = vadd.f32 %v166_v15, %v125_v22  ;;  %v198_v25 = vpop.f32.mrb[3].mxu0  ;;  %v146_v26 = vadd.f32 %v166_v15, %v145_v23  ;;  %v210_v27 = vpop.f32.mrb[3].mxu1 }
  0xe5   :  { %156 = vst.msk [vmem:[%s331_s3 + $0x8] sm:$0xff] %vm154_vm2, %v126_v24  ;;  %160 = vst.msk [vmem:[%s331_s3 + $0x28] sm:$0xff] %vm154_vm2, %v146_v26 }
  0xe6   :  { %v130_v28 = vpop.f32.mrb[4].mxu0  ;;  %v150_v29 = vpop.f32.mrb[4].mxu1 }
  0xe7   :  { %v131_v30 = vadd.f32 %v166_v15, %v130_v28  ;;  %v201_v31 = vpop.f32.mrb[5].mxu0  ;;  %v151_v32 = vadd.f32 %v166_v15, %v150_v29  ;;  %v213_v33 = vpop.f32.mrb[5].mxu1 }
  0xe9   :  { %157 = vst.msk [vmem:[%s331_s3 + $0x10] sm:$0xff] %vm154_vm2, %v131_v30  ;;  %161 = vst.msk [vmem:[%s331_s3 + $0x30] sm:$0xff] %vm154_vm2, %v151_v32 }
  0xea   :  { %v135_v34 = vpop.f32.mrb[6].mxu0 }
  0xeb   :  { %v136_v35 = vadd.f32 %v166_v15, %v135_v34  ;;  %v204_v36 = vpop.f32.mrb[7].mxu0 }
  0xed   :  { %158 = vst.msk [vmem:[%s331_s3 + $0x18] sm:$0xff] %vm154_vm2, %v136_v35 }

</bundles_post_ra>
